<compile_context>
chip_gen: v6e
topology: v6e:2x2x1
jax: 0.10.0
libtpu: 0.0.40
codegen_flags: <defaults>
</compile_context>

<pallas_src>
import jax
import jax.numpy as jnp
from jax.experimental import pallas as pl
from jax.experimental.pallas import tpu as pltpu


def _round_up(x, m):
    return ((x + m - 1) // m) * m


# ----------------------------------------------------------------------------
# Kernel: fused (stem-conv ∘ 1x1-conv) matmul + folded BatchNorm bias + SiLU
# ----------------------------------------------------------------------------
def _fused_embed_kernel(p_ref, w_ref, b_ref, o_ref):
    # (tm, K) bf16 @ (K, Dp) bf16 -> f32 on the MXU; bias + SiLU on VPU/EUP.
    y = jnp.dot(p_ref[...], w_ref[...], preferred_element_type=jnp.float32)
    y = y + b_ref[...]
    o_ref[...] = y * jax.nn.sigmoid(y)          # SiLU


# ----------------------------------------------------------------------------
# Wrapper
# ----------------------------------------------------------------------------
def hybrid_embed_forward(x_nchw, params, *, eps=1e-5, tm=512, lane=128):
    """Hybrid_embed.forward: returns (B, Ho*Wo, dims)."""
    stride, pad = 4, 1
    B, Cin, H, W = x_nchw.shape
    KH, KW, _, Cstem = params["w_stem"].shape
    D = params["w_1x1"].shape[1]
    assert KH <= stride and KW <= stride  # space-to-depth im2col validity

    Ho = (H + 2 * pad - KH) // stride + 1
    Wo = (W + 2 * pad - KW) // stride + 1
    M = B * Ho * Wo
    K = KH * KW * Cin

    # --- glue: NCHW -> NHWC, pad, space-to-depth im2col (no 9-way gather) ---
    x = jnp.transpose(x_nchw, (0, 2, 3, 1))
    pad_b = max(pad, stride * Ho - (H + pad))
    pad_r = max(pad, stride * Wo - (W + pad))
    xp = jnp.pad(x, ((0, 0), (pad, pad_b), (pad, pad_r), (0, 0)))
    xs = xp[:, :stride * Ho, :stride * Wo, :]
    xs = xs.reshape(B, Ho, stride, Wo, stride, Cin)
    patches = (xs[:, :, :KH, :, :KW, :]
               .transpose(0, 1, 3, 2, 4, 5)          # (B, Ho, Wo, KH, KW, Cin)
               .reshape(M, K))

    # --- glue: fold stem conv + 1x1 conv + eval-mode BN into one weight -----
    scale = params["bn_gamma"] * jax.lax.rsqrt(params["bn_var"] + eps)
    bias = params["bn_beta"] - params["bn_mean"] * scale
    w_stem_mat = params["w_stem"].reshape(K, Cstem)
    w_fused = jnp.dot(w_stem_mat, params["w_1x1"] * scale[None, :])   # (K, D)

    # --- lane-dense / tile-aligned padding ----------------------------------
    Dp = _round_up(D, lane)                   # lane-dense output channels
    tm_eff = min(tm, _round_up(M, 8))         # big row tiles, adaptive for demo
    Mp = _round_up(M, tm_eff)                 # no dropped tail tile

    patches_p = jnp.pad(patches, ((0, Mp - M), (0, 0))).astype(jnp.bfloat16)
    w_p = jnp.pad(w_fused, ((0, 0), (0, Dp - D))).astype(jnp.bfloat16)
    bias_p = jnp.pad(bias, (0, Dp - D)).reshape(1, Dp).astype(jnp.float32)

    out = pl.pallas_call(
        _fused_embed_kernel,
        out_shape=jax.ShapeDtypeStruct((Mp, Dp), jnp.float32),
        grid=(Mp // tm_eff,),
        in_specs=[
            pl.BlockSpec((tm_eff, K), lambda i: (i, 0)),
            pl.BlockSpec((K, Dp), lambda i: (0, 0)),
            pl.BlockSpec((1, Dp), lambda i: (0, 0)),
        ],
        out_specs=pl.BlockSpec((tm_eff, Dp), lambda i: (i, 0)),
        compiler_params=pltpu.CompilerParams(
            dimension_semantics=("parallel",)),
    )(patches_p, w_p, bias_p)

    # == x.flatten(2).transpose(1, 2) in the PyTorch module.
    return out[:M, :D].reshape(B, Ho * Wo, D)


# ----------------------------------------------------------------------------
# Pure-JAX reference (for correctness check only)
# ----------------------------------------------------------------------------
def _reference(x_nchw, params, eps=1e-5):
    x = jnp.transpose(x_nchw, (0, 2, 3, 1))
    feat = jax.lax.conv_general_dilated(
        x, params["w_stem"], window_strides=(4, 4), padding=((1, 1), (1, 1)),
        dimension_numbers=("NHWC", "HWIO", "NHWC"))
    y = jnp.einsum("bhwc,cd->bhwd", feat, params["w_1x1"])
    scale = params["bn_gamma"] * jax.lax.rsqrt(params["bn_var"] + eps)
    bias = params["bn_beta"] - params["bn_mean"] * scale
    y = y * scale + bias
    y = y * jax.nn.sigmoid(y)
    B, Ho, Wo, D = y.shape
    return y.reshape(B, Ho * Wo, D)


# ----------------------------------------------------------------------------
# Main
# ----------------------------------------------------------------------------
if __name__ == "__main__":
    B, C_in, H, W = 2, 4, 16, 16      # small img_size / channels
    STEM_OUT = 40                     # conv_stem output channels (from __init__)
    DIMS = 32                         # embedding dim

    key = jax.random.PRNGKey(0)
    k_x, k_stem, k_1x1, k_g, k_b, k_m, k_v = jax.random.split(key, 7)

    x = jax.random.normal(k_x, (B, C_in, H, W), dtype=jnp.float32)

    params = {
        # PyTorch stem weight is (40, C_in, 3, 3); stored here as (3, 3, C_in, 40).
        "w_stem": 0.05 * jax.random.normal(k_stem, (3, 3, C_in, STEM_OUT),
                                           dtype=jnp.float32),
        # PyTorch 1x1 weight is (DIMS, 40, 1, 1); stored here as (40, DIMS).
        "w_1x1": 0.05 * jax.random.normal(k_1x1, (STEM_OUT, DIMS),
                                          dtype=jnp.float32),
        "bn_gamma": 1.0 + 0.1 * jax.random.normal(k_g, (DIMS,), dtype=jnp.float32),
        "bn_beta": 0.1 * jax.random.normal(k_b, (DIMS,), dtype=jnp.float32),
        "bn_mean": 0.1 * jax.random.normal(k_m, (DIMS,), dtype=jnp.float32),
        "bn_var": jnp.abs(1.0 + 0.1 * jax.random.normal(k_v, (DIMS,),
                                                        dtype=jnp.float32)),
    }

    out = jax.block_until_ready(hybrid_embed_forward(x, params))
    # Expected output shape: (B, Ho*Wo, DIMS) = (2, 16, 32)
    assert out.shape == (B, 16, DIMS), out.shape
    assert out.dtype == jnp.float32

    ref = jax.block_until_ready(_reference(x, params))
    max_err = float(jnp.max(jnp.abs(out - ref)))
    assert max_err < 2e-2, f"max abs error vs reference: {max_err}"

    print("KERNEL_OK")
</pallas_src>

<mosaic_0001>
module attributes {stable_mosaic.version = 11 : i64} {
  func.func @_fused_embed_kernel(%arg0: i32, %arg1: memref<32x36xbf16, #tpu.memory_space<vmem>>, %arg2: memref<36x128xbf16, #tpu.memory_space<vmem>>, %arg3: memref<1x128xf32, #tpu.memory_space<vmem>>, %arg4: memref<32x128xf32, #tpu.memory_space<vmem>>) attributes {dimension_semantics = [#tpu.dimension_semantics<parallel>], iteration_bounds = array<i64: 1>, scalar_prefetch = 0 : i64, scratch_operands = 0 : i64, tpu.core_type = #tpu.core_type<tc>, window_params = [{transform_indices = @transform_0, window_bounds = array<i64: 32, 36>}, {pipeline_mode = #tpu.pipeline_mode<synchronous>, transform_indices = @transform_1, window_bounds = array<i64: 36, 128>}, {pipeline_mode = #tpu.pipeline_mode<synchronous>, transform_indices = @transform_2, window_bounds = array<i64: 1, 128>}, {transform_indices = @transform_3, window_bounds = array<i64: 32, 128>}]} {
    %c0 = arith.constant 0 : index
    %c0_0 = arith.constant 0 : index
    %0 = vector.load %arg1[%c0, %c0_0] : memref<32x36xbf16, #tpu.memory_space<vmem>>, vector<32x36xbf16>
    %c0_1 = arith.constant 0 : index
    %c0_2 = arith.constant 0 : index
    %1 = vector.load %arg2[%c0_1, %c0_2] : memref<36x128xbf16, #tpu.memory_space<vmem>>, vector<36x128xbf16>
    %cst = arith.constant dense<0.000000e+00> : vector<32x128xf32>
    %2 = tpu.matmul %0, %1, %cst {dimension_numbers = #tpu.dot_dimension_numbers<[1], [0], [0], [1], [0, 0, 1, 1], [], []>} : vector<32x36xbf16>, vector<36x128xbf16>, vector<32x128xf32> -> vector<32x128xf32>
    %c0_3 = arith.constant 0 : index
    %c0_4 = arith.constant 0 : index
    %3 = vector.load %arg3[%c0_3, %c0_4] : memref<1x128xf32, #tpu.memory_space<vmem>>, vector<1x128xf32>
    %4 = vector.broadcast %3 : vector<1x128xf32> to vector<32x128xf32>
    %5 = arith.addf %2, %4 : vector<32x128xf32>
    %6 = arith.negf %5 : vector<32x128xf32>
    %7 = math.exp %6 : vector<32x128xf32>
    %cst_5 = arith.constant 1.000000e+00 : f32
    %8 = vector.broadcast %cst_5 : f32 to vector<32x128xf32>
    %9 = arith.addf %8, %7 : vector<32x128xf32>
    %10 = arith.divf %8, %9 : vector<32x128xf32>
    %11 = arith.mulf %5, %10 : vector<32x128xf32>
    %c0_6 = arith.constant 0 : index
    %c0_7 = arith.constant 0 : index
    %12 = vector.load %arg4[%c0_6, %c0_7] : memref<32x128xf32, #tpu.memory_space<vmem>>, vector<32x128xf32>
    tpu.vector_store %arg4[%c0_6, %c0_7], %11 {strides = array<i32>} : memref<32x128xf32, #tpu.memory_space<vmem>>, vector<32x128xf32>,
    return
  }
  func.func @transform_0(%arg0: i32) -> (i32, i32) {
    %c0_i32 = arith.constant 0 : i32
    %c0_i32_0 = arith.constant 0 : i32
    return %arg0, %c0_i32 : i32, i32
  }
  func.func @transform_1(%arg0: i32) -> (i32, i32) {
    %c0_i32 = arith.constant 0 : i32
    %c0_i32_0 = arith.constant 0 : i32
    %c0_i32_1 = arith.constant 0 : i32
    return %c0_i32, %c0_i32_0 : i32, i32
  }
  func.func @transform_2(%arg0: i32) -> (i32, i32) {
    %c0_i32 = arith.constant 0 : i32
    %c0_i32_0 = arith.constant 0 : i32
    %c0_i32_1 = arith.constant 0 : i32
    return %c0_i32, %c0_i32_0 : i32, i32
  }
  func.func @transform_3(%arg0: i32) -> (i32, i32) {
    %c0_i32 = arith.constant 0 : i32
    %c0_i32_0 = arith.constant 0 : i32
    return %arg0, %c0_i32 : i32, i32
  }
}

</mosaic_0001>

<bundles_post_ra>
// kernel: tpu_custom_call.1
= control target key start
LH: loop header
LB: loop body
LE: loop exit
PB: predicated region body
PF: predicated region fallthrough
CT: control target
= control target key end

     0   :  { %8 = vsyncpa [#allocation3], 0  ;;  %s356_s0 = inlined_call_operand.hbm [shape: bf16[32,36], index: 0, kind: input, shape index: {}]   ;;  %s357_s1 = inlined_call_operand.hbm [shape: bf16[36,128], index: 1, kind: input, shape index: {}]   ;;  %s358_s2 = inlined_call_operand.vmem [shape: f32[1,128], index: 2, kind: input, shape index: {}]   ;;  %s359_s3 = inlined_call_operand.hbm [shape: f32[32,128], index: 3, kind: output, shape index: {}]  }
   0x1   :  { %9 = vsyncpa [#allocation6], 0 }
   0x2   :  { %10 = vsyncpa [#allocation4], 0  ;;  %s317_s12 = smov [#allocation2]  }
   0x3   :  { %s16_s13 = sshll.u32 %s317_s12, 4  ;;  %s17_s13 = int_to_ptr.vmem [resolvable:$true] %s16_s13 }
   0x4   :  { %s259_s14 = scalar_lea.vmem %s17_s13, 256  ;;  %p264_p1 = scmp.lt.s32.totalorder %s17_s13, %s17_s13 }
   0x5   :  { %p260_p0 = scmp.ne.s32.totalorder %s17_s13, %s259_s14  ;;  %p265_p2 = scmp.lt.s32.totalorder %s259_s14, %s259_s14 }
   0x7   :  { %p266_p3 = por %p265_p2, %p264_p1 }
   0x9   :  { %p267_p4 = pnand %p266_p3, %p260_p0 }
   0xb   :  { %270 = shalt.err (!%p267_p4)
}
   0xc   :  { %s318_s15 = smov 64   ;;  %s319_s16 = smov 4  }
   0xd   :  { %22 = dma.hbm_to_vmem [thread:$0]  %s356_s0, 256, %s17_s13, [#allocation3], %s318_s15, %s318_s15, %s319_s16  }
   0xe   :  { %s320_s19 = smov [#allocation5]  }
   0xf   :  { %s28_s20 = sshll.u32 %s320_s19, 4  ;;  %s29_s20 = int_to_ptr.vmem [resolvable:$true] %s28_s20 }
  0x10   :  { %s279_s21 = scalar_lea.vmem %s29_s20, 320  ;;  %p284_p6 = scmp.lt.s32.totalorder %s29_s20, %s29_s20 }
  0x11   :  { %p280_p5 = scmp.ne.s32.totalorder %s29_s20, %s279_s21  ;;  %p285_p7 = scmp.lt.s32.totalorder %s279_s21, %s279_s21 }
  0x13   :  { %p286_p8 = por %p285_p7, %p284_p6 }
  0x15   :  { %p287_p9 = pnand %p286_p8, %p280_p5 }
  0x17   :  { %290 = shalt.err (!%p287_p9)
}
  0x18   :  { %34 = dma.hbm_to_vmem [thread:$0]  %s357_s1, 320, %s29_s20, [#allocation6], %s318_s15, %s318_s15, %s319_s16  }
  0x19   :  { %311 = dma.done.wait [#allocation3], 256  }
  0x1a   :  { %312 = vsyncadd [#allocation3], 4294967040 }
  0x1b   :  { %313 = dma.done.wait [#allocation6], 320  }
  0x1c   :  { %314 = vsyncadd [#allocation6], 4294966976  ;;  %vm92_vm0 = vcmask 1041408   ;;  %v230_v0 = vld [vmem:[#allocation5 + $0x10] ss:$0 sps:$4 sm:$0x33]  }
  0x1d   :  { %v231_v1 = vld [vmem:[#allocation5 + $0x8] sm:$0xff]   ;;  %222 = vmatprep.subr.msk.bf16.mxu0 %vm92_vm0, %v230_v0  ;;  %v94_v2 = vsel %vm92_vm0, %v230_v0, 0  ;;  %vm85_vm1 = vcmask 293888   ;;  %v233_v3 = vld [vmem:[#allocation2] sm:$0xff]   ;;  %v232_v4 = vld [vmem:[#allocation5] sm:$0xff]  }
  0x1e   :  { %213 = vmatpush3.bf16.msra.mxu0 %v94_v2  ;;  %218 = vmatprep.mubr.msk.bf16.mxu0 %vm85_vm1, %v233_v3  ;;  %v234_v5 = vld [vmem:[#allocation2 + $0x8] sm:$0xff]   ;;  %v195_v6 = vld [vmem:[%s358_s2] ss:$0 sm:$0xff]  ;;  %s321_s2 = smov [#allocation7]  }
  0x1f   :  { %214 = vmatprep.subr.bf16.mxu0 %v231_v1  ;;  %s182_s24 = sshll.u32 %s321_s2, 4  ;;  %s183_s24 = int_to_ptr.vmem [resolvable:$true] %s182_s24 }
  0x20   :  { %s291_s25 = scalar_lea.vmem %s183_s24, 512  ;;  %p296_p11 = scmp.lt.s32.totalorder %s183_s24, %s183_s24 }
  0x21   :  { %p292_p10 = scmp.ne.s32.totalorder %s183_s24, %s291_s25  ;;  %p297_p12 = scmp.lt.s32.totalorder %s291_s25, %s291_s25 }
  0x22   :  { %215 = vmatpush3.bf16.msra.mxu0 %v231_v1 }
  0x23   :  { %216 = vmatprep.subr.bf16.mxu0 %v232_v4  ;;  %p298_p13 = por %p297_p12, %p296_p11 }
  0x25   :  { %p299_p0 = pnand %p298_p13, %p292_p10 }
  0x26   :  { %217 = vmatpush3.bf16.msra.mxu0 %v232_v4 }
  0x29   :  { %219 = vmatmul.mubr.msk.bf16.vlgmr.msra.gmra.mxu0 %vm85_vm1, %v234_v5 }
  0xe9   :  { %v220_v7 = vpop.f32.mrf.mxu0 }
  0xea   :  { %v139_v8 = vadd.f32 %v220_v7, %v195_v6 }
  0xeb   :  { %v130_v9 = vpop.f32.mrf.mxu0 }
  0xec   :  { %v205_v10 = vmul.f32 -1.442695, %v139_v8  ;;  %v131_v11 = vadd.f32 %v195_v6, %v130_v9 }
  0xed   :  { %v221_v12 = vpop.f32.mrf.mxu0 }
  0xee   :  { %235 = vpow2.f32 %v205_v10  ;;  %v203_v13 = vmul.f32 -1.442695, %v131_v11  ;;  %v142_v14 = vadd.f32 %v221_v12, %v195_v6 }
  0xef   :  { %v133_v15 = vpop.f32.mrf.mxu0 }
  0xf0   :  { %237 = vpow2.f32 %v203_v13  ;;  %v206_v16 = vmul.f32 -1.442695, %v142_v14  ;;  %v134_v17 = vadd.f32 %v195_v6, %v133_v15 }
  0xf2   :  { %239 = vpow2.f32 %v206_v16  ;;  %v204_v18 = vmul.f32 -1.442695, %v134_v17 }
  0xf4   :  { %241 = vpow2.f32 %v204_v18 }
  0xfb   :  { %v236_v19 = vpop.eup %235 }
  0xfc   :  { %v159_v20 = vadd.f32 1.0, %v236_v19 }
  0xfd   :  { %v238_v21 = vpop.eup %237 }
  0xfe   :  { %243 = vrcp.f32 %v159_v20  ;;  %v157_v22 = vadd.f32 1.0, %v238_v21 }
  0xff   :  { %v240_v23 = vpop.eup %239 }
 0x100   :  { %245 = vrcp.f32 %v157_v22  ;;  %v160_v24 = vadd.f32 1.0, %v240_v23 }
 0x101   :  { %v242_v25 = vpop.eup %241 }
 0x102   :  { %247 = vrcp.f32 %v160_v24  ;;  %v158_v26 = vadd.f32 1.0, %v242_v25 }
 0x104   :  { %249 = vrcp.f32 %v158_v26 }
 0x10b   :  { %v244_v27 = vpop.eup %243 }
 0x10c   :  { %v171_v28 = vmul.f32 %v244_v27, %v139_v8 }
 0x10d   :  { %v246_v29 = vpop.eup %245 }
 0x10e   :  { %175 = vst [vmem:[#allocation7 + $0x10] sm:$0xff] %v171_v28  ;;  %v169_v30 = vmul.f32 %v246_v29, %v131_v11 }
 0x10f   :  { %v248_v31 = vpop.eup %247 }
 0x110   :  { %173 = vst [vmem:[#allocation7] sm:$0xff] %v169_v30  ;;  %v172_v32 = vmul.f32 %v248_v31, %v142_v14 }
 0x111   :  { %v250_v33 = vpop.eup %249 }
 0x112   :  { %176 = vst [vmem:[#allocation7 + $0x18] sm:$0xff] %v172_v32  ;;  %v170_v34 = vmul.f32 %v250_v33, %v134_v17 }
 0x114   :  { %174 = vst [vmem:[#allocation7 + $0x8] sm:$0xff] %v170_v34 }
 0x115   :  { %302 = shalt.err (!%p299_p0)
}
 0x116   :  { %s322_s26 = smov 128   ;;  %s323_s27 = smov 8  }
 0x117   :  { %188 = dma.vmem_to_hbm [thread:$0]  %s183_s24, 512, %s359_s3, [#allocation4], %s322_s26, %s322_s26, %s323_s27  }
 0x118   :  { %315 = dma.done.wait [#allocation4], 512  }
 0x119   :  { %316 = vsyncadd [#allocation4], 4294966784 }
 0x11a   :  { %192 = vsyncpa [#allocation3], 1 }
 0x11b   :  { %193 = vsyncpa [#allocation6], 1 }
 0x11c   :  { %194 = vsyncpa [#allocation4], 1 }

</bundles_post_ra>
